<compile_context>
chip_gen: v6e
topology: v6e:2x2x1
jax: 0.10.0
libtpu: 0.0.40
codegen_flags: <defaults>
</compile_context>

<pallas_src>
import math
import functools

import jax
import jax.numpy as jnp
from jax import lax
from jax.experimental import pallas as pl
from jax.experimental.pallas import tpu as pltpu


def _round_up(v, m):
    return (v + m - 1) // m * m


def _pad2d(a, rows, cols):
    pr = rows - a.shape[0]
    pc = cols - a.shape[1]
    if pr or pc:
        a = jnp.pad(a, ((0, pr), (0, pc)))
    return a


def _edge_kernel(x_ref, g_ref, b_ref, edge_out_ref):
    """Phase 1: edge[e_tile] = sum over N tiles of G_tile^T @ (x_tile + bias).

    Grid = (e_tiles, n_tiles); reduction (N) axis last.  The output block is
    resident across the reduction axis and doubles as the f32 accumulator.
    """
    @pl.when(pl.program_id(1) == 0)
    def _():
        edge_out_ref[...] = jnp.zeros_like(edge_out_ref)

    g = g_ref[...]                                   # (tn, te), f32 or bf16
    xb = (x_ref[...] + b_ref[...]).astype(g.dtype)   # f32 bias add, then MXU dtype
    # Contract over dim 0 of both operands == G_tile.T @ xb_tile, without
    # materializing a transposed copy of G in VMEM.
    edge_out_ref[...] += lax.dot_general(
        g, xb,
        dimension_numbers=(((0,), (0,)), ((), ())),
        preferred_element_type=jnp.float32,
    )


def _node_kernel(g_ref, edge_ref, node_out_ref):
    """Phase 2: node[n_tile] = sum over E tiles of G_tile @ edge_tile."""
    @pl.when(pl.program_id(1) == 0)
    def _():
        node_out_ref[...] = jnp.zeros_like(node_out_ref)

    g = g_ref[...]                                   # (tn, te)
    e = edge_ref[...].astype(g.dtype)                # (te, F_pad) f32 -> MXU dtype
    node_out_ref[...] += jnp.dot(g, e, preferred_element_type=jnp.float32)


@functools.partial(jax.jit, static_argnames=("use_bf16", "row_tile", "e_tile"))
def hgnn_conv(x, G, bias=None, *, use_bf16=False, row_tile=512, e_tile=512):
    """HGNN_conv forward. x: (N, F), G: (N, E), bias: (F,) or None.

    Returns (node_out (N, F), edge_out (E, F)), both in x.dtype.
    """
    N, F = x.shape
    Ng, E = G.shape
    assert Ng == N, f"G rows ({Ng}) must match x rows ({N})"
    if bias is None:
        bias = jnp.zeros((F,), jnp.float32)
    assert bias.shape == (F,), "bias broadcast requires F == out_ft == x.shape[1]"

    mxu_dtype = jnp.bfloat16 if use_bf16 else jnp.float32

    # Lane-dense tiling: last dims multiples of 128, row tiles multiples of 8.
    row_tile = max(8, _round_up(row_tile, 8))
    e_tile = max(128, _round_up(e_tile, 128))

    F_pad = _round_up(F, 128)
    E_pad = _round_up(E, 128)
    te = e_tile if E_pad > e_tile else E_pad
    E_pad = _round_up(E_pad, te)
    e_tiles = E_pad // te

    tn = min(row_tile, _round_up(N, 8))
    N_pad = _round_up(N, tn)
    n_tiles = N_pad // tn

    # Fused pad + dtype cast (one XLA pass per operand; pad elided when aligned).
    # G (the dominant HBM traffic, read by both phases) is shipped in the MXU
    # dtype; x / bias stay f32 so the bias add is exact.
    x_p = _pad2d(x.astype(jnp.float32), N_pad, F_pad)
    G_p = _pad2d(G.astype(mxu_dtype), N_pad, E_pad)
    b_p = _pad2d(bias.astype(jnp.float32).reshape(1, F), 1, F_pad)

    g_bytes = G_p.size * jnp.dtype(mxu_dtype).itemsize
    edge_bytes = E_pad * F_pad * 4
    flops = 2 * N_pad * E_pad * F_pad

    # ---- Phase 1: edge = G^T @ (x + bias), E tiles x N-reduction tiles ----
    edge_cost = pl.CostEstimate(
        flops=flops,
        transcendentals=0,
        bytes_accessed=x_p.size * 4 * e_tiles + g_bytes + b_p.size * 4 + edge_bytes,
    )
    edge_p = pl.pallas_call(
        _edge_kernel,
        out_shape=jax.ShapeDtypeStruct((E_pad, F_pad), jnp.float32),
        grid_spec=pltpu.PrefetchScalarGridSpec(
            num_scalar_prefetch=0,
            grid=(e_tiles, n_tiles),                               # N reduction last
            in_specs=[
                pl.BlockSpec((tn, F_pad), lambda e, n: (n, 0)),    # x tile
                pl.BlockSpec((tn, te), lambda e, n: (n, e)),       # G tile
                pl.BlockSpec((1, F_pad), lambda e, n: (0, 0)),     # bias (resident)
            ],
            out_specs=pl.BlockSpec((te, F_pad), lambda e, n: (e, 0)),
        ),
        compiler_params=pltpu.CompilerParams(
            dimension_semantics=("parallel", "arbitrary"),
        ),
        cost_estimate=edge_cost,
    )(x_p, G_p, b_p)

    # ---- Phase 2: node = G @ edge, N tiles x E-reduction tiles ----
    node_cost = pl.CostEstimate(
        flops=flops,
        transcendentals=0,
        bytes_accessed=g_bytes + edge_bytes * n_tiles + N_pad * F_pad * 4,
    )
    node_p = pl.pallas_call(
        _node_kernel,
        out_shape=jax.ShapeDtypeStruct((N_pad, F_pad), jnp.float32),
        grid_spec=pltpu.PrefetchScalarGridSpec(
            num_scalar_prefetch=0,
            grid=(n_tiles, e_tiles),                               # E reduction last
            in_specs=[
                pl.BlockSpec((tn, te), lambda i, k: (i, k)),       # G tile
                pl.BlockSpec((te, F_pad), lambda i, k: (k, 0)),    # edge tile
            ],
            out_specs=pl.BlockSpec((tn, F_pad), lambda i, k: (i, 0)),
        ),
        compiler_params=pltpu.CompilerParams(
            dimension_semantics=("parallel", "arbitrary"),
        ),
        cost_estimate=node_cost,
    )(G_p, edge_p)

    out_dtype = x.dtype
    node_out = node_p[:N, :F].astype(out_dtype)
    edge_out = edge_p[:E, :F].astype(out_dtype)
    return node_out, edge_out


def make_params(key, in_ft, out_ft):
    """Deterministic parameter init mirroring HGNN_conv.__init__/reset_parameters."""
    k_w, k_w1, k_b = jax.random.split(key, 3)
    stdv = 1.0 / math.sqrt(out_ft)
    # weight / weight1 are created by the module but unused in forward; we
    # still materialize them for shape fidelity.
    weight = jax.random.uniform(k_w, (in_ft, out_ft), jnp.float32, -stdv, stdv)
    weight1 = jax.random.uniform(k_w1, (in_ft, out_ft), jnp.float32, -stdv, stdv)
    bias = jax.random.uniform(k_b, (out_ft,), jnp.float32, -stdv, stdv)
    return weight, weight1, bias


if __name__ == "__main__":
    key = jax.random.PRNGKey(0)
    k_x, k_g, k_p = jax.random.split(key, 3)

    # Small shapes consistent with the forward: N nodes, E hyperedges, F=out_ft feats.
    N, E, F = 128, 64, 32
    in_ft, out_ft = F, F

    x = jax.random.normal(k_x, (N, F), jnp.float32)
    G = jax.random.normal(k_g, (N, E), jnp.float32)
    _weight, _weight1, bias = make_params(k_p, in_ft, out_ft)

    # f32 path (default): tight correctness check against pure-JAX reference.
    node_out, edge_out = hgnn_conv(x, G, bias)
    jax.block_until_ready((node_out, edge_out))

    xb_ref = x + bias
    edge_ref = G.T @ xb_ref
    node_ref = G @ edge_ref
    assert edge_out.shape == (E, F) and node_out.shape == (N, F)
    assert jnp.allclose(edge_out, edge_ref, atol=1e-4, rtol=1e-4)
    assert jnp.allclose(node_out, node_ref, atol=1e-4, rtol=1e-4)

    # bf16 MXU path (approximate: G and xb are rounded to bf16 before the MXU;
    # loose tolerance for this dense random-normal toy G).
    node_bf, edge_bf = hgnn_conv(x, G, bias, use_bf16=True)
    jax.block_until_ready((node_bf, edge_bf))
    assert jnp.allclose(edge_bf, edge_ref, atol=0.5, rtol=0.05)
    assert jnp.allclose(node_bf, node_ref, atol=2.0, rtol=0.05)

    # Exercise a multi-tile configuration (E and N tiling paths) at small cost.
    node_t, edge_t = hgnn_conv(x, G, bias, row_tile=64, e_tile=128)
    jax.block_until_ready((node_t, edge_t))
    assert jnp.allclose(edge_t, edge_ref, atol=1e-4, rtol=1e-4)
    assert jnp.allclose(node_t, node_ref, atol=1e-4, rtol=1e-4)

    print("KERNEL_OK")
</pallas_src>

<mosaic_0001>
module attributes {stable_mosaic.version = 11 : i64} {
  func.func @_node_kernel(%arg0: i32, %arg1: i32, %arg2: memref<128x128xf32, #tpu.memory_space<vmem>>, %arg3: memref<128x128xf32, #tpu.memory_space<vmem>>, %arg4: memref<128x128xf32, #tpu.memory_space<vmem>>) attributes {dimension_semantics = [#tpu.dimension_semantics<parallel>, #tpu.dimension_semantics<arbitrary>], iteration_bounds = array<i64: 1, 1>, scalar_prefetch = 0 : i64, scratch_operands = 0 : i64, tpu.core_type = #tpu.core_type<tc>, window_params = [{transform_indices = @transform_0, window_bounds = array<i64: 128, 128>}, {transform_indices = @transform_1, window_bounds = array<i64: 128, 128>}, {transform_indices = @transform_2, window_bounds = array<i64: 128, 128>}]} {
    %c0_i32 = arith.constant 0 : i32
    %0 = arith.cmpi eq, %arg1, %c0_i32 : i32
    %1 = arith.extui %0 : i1 to i32
    %c0_i32_0 = arith.constant 0 : i32
    %2 = arith.cmpi ne, %1, %c0_i32_0 : i32
    scf.if %2 {
      %cst_8 = arith.constant 0.000000e+00 : f32
      %9 = vector.broadcast %cst_8 : f32 to vector<128x128xf32>
      %c0_9 = arith.constant 0 : index
      %c0_10 = arith.constant 0 : index
      %10 = vector.load %arg4[%c0_9, %c0_10] : memref<128x128xf32, #tpu.memory_space<vmem>>, vector<128x128xf32>
      tpu.vector_store %arg4[%c0_9, %c0_10], %9 {strides = array<i32>} : memref<128x128xf32, #tpu.memory_space<vmem>>, vector<128x128xf32>,
    } else {
    }
    %c0 = arith.constant 0 : index
    %c0_1 = arith.constant 0 : index
    %3 = vector.load %arg2[%c0, %c0_1] : memref<128x128xf32, #tpu.memory_space<vmem>>, vector<128x128xf32>
    %c0_2 = arith.constant 0 : index
    %c0_3 = arith.constant 0 : index
    %4 = vector.load %arg3[%c0_2, %c0_3] : memref<128x128xf32, #tpu.memory_space<vmem>>, vector<128x128xf32>
    %c0_4 = arith.constant 0 : index
    %c0_5 = arith.constant 0 : index
    %5 = vector.load %arg4[%c0_4, %c0_5] : memref<128x128xf32, #tpu.memory_space<vmem>>, vector<128x128xf32>
    %cst = arith.constant dense<0.000000e+00> : vector<128x128xf32>
    %6 = tpu.matmul %3, %4, %cst {dimension_numbers = #tpu.dot_dimension_numbers<[1], [0], [0], [1], [0, 0, 1, 1], [], []>} : vector<128x128xf32>, vector<128x128xf32>, vector<128x128xf32> -> vector<128x128xf32>
    %7 = arith.addf %5, %6 : vector<128x128xf32>
    %c0_6 = arith.constant 0 : index
    %c0_7 = arith.constant 0 : index
    %8 = vector.load %arg4[%c0_6, %c0_7] : memref<128x128xf32, #tpu.memory_space<vmem>>, vector<128x128xf32>
    tpu.vector_store %arg4[%c0_6, %c0_7], %7 {strides = array<i32>} : memref<128x128xf32, #tpu.memory_space<vmem>>, vector<128x128xf32>,
    return
  }
  func.func @transform_0(%arg0: i32, %arg1: i32) -> (i32, i32) {
    %c0_i32 = arith.constant 0 : i32
    return %arg0, %arg1 : i32, i32
  }
  func.func @transform_1(%arg0: i32, %arg1: i32) -> (i32, i32) {
    %c0_i32 = arith.constant 0 : i32
    %c0_i32_0 = arith.constant 0 : i32
    return %arg1, %c0_i32 : i32, i32
  }
  func.func @transform_2(%arg0: i32, %arg1: i32) -> (i32, i32) {
    %c0_i32 = arith.constant 0 : i32
    %c0_i32_0 = arith.constant 0 : i32
    return %arg0, %c0_i32 : i32, i32
  }
}

module attributes {stable_mosaic.version = 11 : i64} {
  func.func @_edge_kernel(%arg0: i32, %arg1: i32, %arg2: memref<128x128xf32, #tpu.memory_space<vmem>>, %arg3: memref<128x128xf32, #tpu.memory_space<vmem>>, %arg4: memref<1x128xf32, #tpu.memory_space<vmem>>, %arg5: memref<128x128xf32, #tpu.memory_space<vmem>>) attributes {dimension_semantics = [#tpu.dimension_semantics<parallel>, #tpu.dimension_semantics<arbitrary>], iteration_bounds = array<i64: 1, 1>, scalar_prefetch = 0 : i64, scratch_operands = 0 : i64, tpu.core_type = #tpu.core_type<tc>, window_params = [{transform_indices = @transform_0, window_bounds = array<i64: 128, 128>}, {transform_indices = @transform_1, window_bounds = array<i64: 128, 128>}, {pipeline_mode = #tpu.pipeline_mode<synchronous>, transform_indices = @transform_2, window_bounds = array<i64: 1, 128>}, {transform_indices = @transform_3, window_bounds = array<i64: 128, 128>}]} {
    %c0_i32 = arith.constant 0 : i32
    %0 = arith.cmpi eq, %arg1, %c0_i32 : i32
    %1 = arith.extui %0 : i1 to i32
    %c0_i32_0 = arith.constant 0 : i32
    %2 = arith.cmpi ne, %1, %c0_i32_0 : i32
    scf.if %2 {
      %cst_10 = arith.constant 0.000000e+00 : f32
      %12 = vector.broadcast %cst_10 : f32 to vector<128x128xf32>
      %c0_11 = arith.constant 0 : index
      %c0_12 = arith.constant 0 : index
      %13 = vector.load %arg5[%c0_11, %c0_12] : memref<128x128xf32, #tpu.memory_space<vmem>>, vector<128x128xf32>
      tpu.vector_store %arg5[%c0_11, %c0_12], %12 {strides = array<i32>} : memref<128x128xf32, #tpu.memory_space<vmem>>, vector<128x128xf32>,
    } else {
    }
    %c0 = arith.constant 0 : index
    %c0_1 = arith.constant 0 : index
    %3 = vector.load %arg3[%c0, %c0_1] : memref<128x128xf32, #tpu.memory_space<vmem>>, vector<128x128xf32>
    %c0_2 = arith.constant 0 : index
    %c0_3 = arith.constant 0 : index
    %4 = vector.load %arg2[%c0_2, %c0_3] : memref<128x128xf32, #tpu.memory_space<vmem>>, vector<128x128xf32>
    %c0_4 = arith.constant 0 : index
    %c0_5 = arith.constant 0 : index
    %5 = vector.load %arg4[%c0_4, %c0_5] : memref<1x128xf32, #tpu.memory_space<vmem>>, vector<1x128xf32>
    %6 = vector.broadcast %5 : vector<1x128xf32> to vector<128x128xf32>
    %7 = arith.addf %4, %6 : vector<128x128xf32>
    %c0_6 = arith.constant 0 : index
    %c0_7 = arith.constant 0 : index
    %8 = vector.load %arg5[%c0_6, %c0_7] : memref<128x128xf32, #tpu.memory_space<vmem>>, vector<128x128xf32>
    %cst = arith.constant dense<0.000000e+00> : vector<128x128xf32>
    %9 = tpu.matmul %3, %7, %cst {dimension_numbers = #tpu.dot_dimension_numbers<[0], [0], [1], [1], [0, 1, 1, 1], [], []>} : vector<128x128xf32>, vector<128x128xf32>, vector<128x128xf32> -> vector<128x128xf32>
    %10 = arith.addf %8, %9 : vector<128x128xf32>
    %c0_8 = arith.constant 0 : index
    %c0_9 = arith.constant 0 : index
    %11 = vector.load %arg5[%c0_8, %c0_9] : memref<128x128xf32, #tpu.memory_space<vmem>>, vector<128x128xf32>
    tpu.vector_store %arg5[%c0_8, %c0_9], %10 {strides = array<i32>} : memref<128x128xf32, #tpu.memory_space<vmem>>, vector<128x128xf32>,
    return
  }
  func.func @transform_0(%arg0: i32, %arg1: i32) -> (i32, i32) {
    %c0_i32 = arith.constant 0 : i32
    %c0_i32_0 = arith.constant 0 : i32
    return %arg1, %c0_i32 : i32, i32
  }
  func.func @transform_1(%arg0: i32, %arg1: i32) -> (i32, i32) {
    %c0_i32 = arith.constant 0 : i32
    return %arg1, %arg0 : i32, i32
  }
  func.func @transform_2(%arg0: i32, %arg1: i32) -> (i32, i32) {
    %c0_i32 = arith.constant 0 : i32
    %c0_i32_0 = arith.constant 0 : i32
    %c0_i32_1 = arith.constant 0 : i32
    return %c0_i32, %c0_i32_0 : i32, i32
  }
  func.func @transform_3(%arg0: i32, %arg1: i32) -> (i32, i32) {
    %c0_i32 = arith.constant 0 : i32
    %c0_i32_0 = arith.constant 0 : i32
    return %arg0, %c0_i32 : i32, i32
  }
}

</mosaic_0001>

<bundles_post_ra>
// kernel: hgnn_conv.3
= control target key start
LH: loop header
LB: loop body
LE: loop exit
PB: predicated region body
PF: predicated region fallthrough
CT: control target
= control target key end

     0   :  { %s540_s1 = inlined_call_operand.vmem [shape: f32[128,128], index: 1, kind: input, shape index: {}]   ;;  %s541_s0 = inlined_call_operand.vmem [shape: f32[128,128], index: 0, kind: input, shape index: {}]   ;;  %s542_s2 = inlined_call_operand.vmem [shape: f32[128,128], index: 2, kind: output, shape index: {}]  }
   0x1   :  { %v62_v0 = vld [vmem:[%s540_s1 + $0x78] sm:$0xff]  ;;  %v61_v1 = vld [vmem:[%s540_s1 + $0x70] sm:$0xff]  ;;  %v60_v2 = vld [vmem:[%s540_s1 + $0x68] sm:$0xff] }
   0x2   :  { %292 = vmatprep.subr.mxu0 %v62_v0  ;;  %348 = vmatprep.subr.mxu1 %v62_v0  ;;  %v59_v3 = vld [vmem:[%s540_s1 + $0x60] sm:$0xff]  ;;  %v58_v4 = vld [vmem:[%s540_s1 + $0x58] sm:$0xff]  ;;  %v57_v5 = vld [vmem:[%s540_s1 + $0x50] sm:$0xff] }
   0x3   :  { %293 = vmatpush3.msra.mxu0 %v62_v0  ;;  %364 = vmatpush3.msra.mxu1 %v62_v0  ;;  %v56_v6 = vld [vmem:[%s540_s1 + $0x48] sm:$0xff]  ;;  %v55_v7 = vld [vmem:[%s540_s1 + $0x40] sm:$0xff]  ;;  %v54_v8 = vld [vmem:[%s540_s1 + $0x38] sm:$0xff] }
   0x4   :  { %294 = vmatprep.subr.mxu0 %v61_v1  ;;  %349 = vmatprep.subr.mxu1 %v61_v1  ;;  %v53_v9 = vld [vmem:[%s540_s1 + $0x30] sm:$0xff]  ;;  %v52_v10 = vld [vmem:[%s540_s1 + $0x28] sm:$0xff]  ;;  %v51_v11 = vld [vmem:[%s540_s1 + $0x20] sm:$0xff] }
   0x5   :  { %295 = vmatpush3.msra.mxu0 %v61_v1  ;;  %365 = vmatpush3.msra.mxu1 %v61_v1  ;;  %v50_v12 = vld [vmem:[%s540_s1 + $0x18] sm:$0xff]  ;;  %v49_v13 = vld [vmem:[%s540_s1 + $0x10] sm:$0xff]  ;;  %v48_v14 = vld [vmem:[%s540_s1 + $0x8] sm:$0xff] }
   0x6   :  { %296 = vmatprep.subr.mxu0 %v60_v2  ;;  %350 = vmatprep.subr.mxu1 %v60_v2  ;;  %v47_v15 = vld [vmem:[%s540_s1] sm:$0xff]  ;;  %v32_v18 = vld [vmem:[%s541_s0 + $0x8] sm:$0xff]  ;;  %v33_v20 = vld [vmem:[%s541_s0 + $0x10] sm:$0xff] }
   0x7   :  { %297 = vmatpush3.msra.mxu0 %v60_v2  ;;  %366 = vmatpush3.msra.mxu1 %v60_v2  ;;  %v31_v16 = vld [vmem:[%s541_s0] sm:$0xff]  ;;  %v40_v19 = vld [vmem:[%s541_s0 + $0x48] sm:$0xff]  ;;  %v41_v21 = vld [vmem:[%s541_s0 + $0x50] sm:$0xff] }
   0x8   :  { %298 = vmatprep.subr.mxu0 %v59_v3  ;;  %351 = vmatprep.subr.mxu1 %v59_v3  ;;  %v39_v17 = vld [vmem:[%s541_s0 + $0x40] sm:$0xff]  ;;  %v34_v22 = vld [vmem:[%s541_s0 + $0x18] sm:$0xff]  ;;  %v36_v26 = vld [vmem:[%s541_s0 + $0x28] sm:$0xff] }
   0x9   :  { %299 = vmatpush3.msra.mxu0 %v59_v3  ;;  %367 = vmatpush3.msra.mxu1 %v59_v3  ;;  %v42_v23 = vld [vmem:[%s541_s0 + $0x58] sm:$0xff]  ;;  %v35_v24 = vld [vmem:[%s541_s0 + $0x20] sm:$0xff]  ;;  %v44_v27 = vld [vmem:[%s541_s0 + $0x68] sm:$0xff] }
   0xa   :  { %300 = vmatprep.subr.mxu0 %v58_v4  ;;  %352 = vmatprep.subr.mxu1 %v58_v4  ;;  %v43_v25 = vld [vmem:[%s541_s0 + $0x60] sm:$0xff]  ;;  %v37_v28 = vld [vmem:[%s541_s0 + $0x30] sm:$0xff]  ;;  %v38_v30 = vld [vmem:[%s541_s0 + $0x38] sm:$0xff] }
   0xb   :  { %301 = vmatpush3.msra.mxu0 %v58_v4  ;;  %368 = vmatpush3.msra.mxu1 %v58_v4  ;;  %v45_v29 = vld [vmem:[%s541_s0 + $0x70] sm:$0xff]  ;;  %v46_v31 = vld [vmem:[%s541_s0 + $0x78] sm:$0xff] }
   0xc   :  { %302 = vmatprep.subr.mxu0 %v57_v5  ;;  %353 = vmatprep.subr.mxu1 %v57_v5 }
   0xd   :  { %303 = vmatpush3.msra.mxu0 %v57_v5  ;;  %369 = vmatpush3.msra.mxu1 %v57_v5 }
   0xe   :  { %304 = vmatprep.subr.mxu0 %v56_v6  ;;  %354 = vmatprep.subr.mxu1 %v56_v6 }
   0xf   :  { %305 = vmatpush3.msra.mxu0 %v56_v6  ;;  %370 = vmatpush3.msra.mxu1 %v56_v6 }
  0x10   :  { %306 = vmatprep.subr.mxu0 %v55_v7  ;;  %355 = vmatprep.subr.mxu1 %v55_v7 }
  0x11   :  { %307 = vmatpush3.msra.mxu0 %v55_v7  ;;  %371 = vmatpush3.msra.mxu1 %v55_v7 }
  0x12   :  { %308 = vmatprep.subr.mxu0 %v54_v8  ;;  %356 = vmatprep.subr.mxu1 %v54_v8 }
  0x13   :  { %309 = vmatpush3.msra.mxu0 %v54_v8  ;;  %372 = vmatpush3.msra.mxu1 %v54_v8 }
  0x14   :  { %310 = vmatprep.subr.mxu0 %v53_v9  ;;  %357 = vmatprep.subr.mxu1 %v53_v9 }
  0x15   :  { %311 = vmatpush3.msra.mxu0 %v53_v9  ;;  %373 = vmatpush3.msra.mxu1 %v53_v9 }
  0x16   :  { %312 = vmatprep.subr.mxu0 %v52_v10  ;;  %358 = vmatprep.subr.mxu1 %v52_v10 }
  0x17   :  { %313 = vmatpush3.msra.mxu0 %v52_v10  ;;  %374 = vmatpush3.msra.mxu1 %v52_v10 }
  0x18   :  { %314 = vmatprep.subr.mxu0 %v51_v11  ;;  %359 = vmatprep.subr.mxu1 %v51_v11 }
  0x19   :  { %315 = vmatpush3.msra.mxu0 %v51_v11  ;;  %375 = vmatpush3.msra.mxu1 %v51_v11 }
  0x1a   :  { %316 = vmatprep.subr.mxu0 %v50_v12  ;;  %360 = vmatprep.subr.mxu1 %v50_v12 }
  0x1b   :  { %317 = vmatpush3.msra.mxu0 %v50_v12  ;;  %376 = vmatpush3.msra.mxu1 %v50_v12 }
  0x1c   :  { %318 = vmatprep.subr.mxu0 %v49_v13  ;;  %361 = vmatprep.subr.mxu1 %v49_v13 }
  0x1d   :  { %319 = vmatpush3.msra.mxu0 %v49_v13  ;;  %377 = vmatpush3.msra.mxu1 %v49_v13 }
  0x1e   :  { %320 = vmatprep.subr.mxu0 %v48_v14  ;;  %362 = vmatprep.subr.mxu1 %v48_v14 }
  0x1f   :  { %321 = vmatpush3.msra.mxu0 %v48_v14  ;;  %378 = vmatpush3.msra.mxu1 %v48_v14 }
  0x20   :  { %322 = vmatprep.subr.mxu0 %v47_v15  ;;  %363 = vmatprep.subr.mxu1 %v47_v15 }
  0x21   :  { %323 = vmatpush3.msra.mxu0 %v47_v15  ;;  %379 = vmatpush3.msra.mxu1 %v47_v15 }
  0x22   :  { %324 = vmatprep.mubr.f32.mxu0 %v31_v16  ;;  %336 = vmatprep.mubr.f32.mxu1 %v39_v17 }
  0x23   :  { %325 = vmatmul.mubr.f32.vlgmr.msra.gmra.mxu0 %v32_v18  ;;  %337 = vmatmul.mubr.f32.vlgmr.msra.gmra.mxu1 %v40_v19 }
  0x24   :  { %327 = vmatprep.mubr.f32.mxu0 %v33_v20  ;;  %339 = vmatprep.mubr.f32.mxu1 %v41_v21 }
  0x27   :  { %328 = vmatmul.mubr.f32.gmra.mxu0 %v34_v22  ;;  %340 = vmatmul.mubr.f32.gmra.mxu1 %v42_v23 }
  0x28   :  { %330 = vmatprep.mubr.f32.mxu0 %v35_v24  ;;  %342 = vmatprep.mubr.f32.mxu1 %v43_v25 }
  0x2b   :  { %331 = vmatmul.mubr.f32.gmra.mxu0 %v36_v26  ;;  %343 = vmatmul.mubr.f32.gmra.mxu1 %v44_v27 }
  0x2c   :  { %333 = vmatprep.mubr.f32.mxu0 %v37_v28  ;;  %345 = vmatprep.mubr.f32.mxu1 %v45_v29 }
  0x2f   :  { %334 = vmatmul.mubr.f32.gmra.mxu0 %v38_v30  ;;  %346 = vmatmul.mubr.f32.gmra.mxu1 %v46_v31 }
  0xe3   :  { %v326_v32 = vpop.f32.mrf.mxu0  ;;  %v338_v33 = vpop.f32.mrf.mxu1 }
  0xe4   :  { %241 = vst [vmem:[%s542_s2 + $0x8] sm:$0xff] %v326_v32  ;;  %249 = vst [vmem:[%s542_s2 + $0x48] sm:$0xff] %v338_v33 }
  0xe5   :  { %v145_v34 = vpop.f32.mrf.mxu0  ;;  %v185_v35 = vpop.f32.mrf.mxu1 }
  0xe6   :  { %240 = vst [vmem:[%s542_s2] sm:$0xff] %v145_v34  ;;  %248 = vst [vmem:[%s542_s2 + $0x40] sm:$0xff] %v185_v35 }
  0xe7   :  { %v329_v36 = vpop.f32.mrf.mxu0  ;;  %v341_v37 = vpop.f32.mrf.mxu1 }
  0xe8   :  { %243 = vst [vmem:[%s542_s2 + $0x18] sm:$0xff] %v329_v36  ;;  %251 = vst [vmem:[%s542_s2 + $0x58] sm:$0xff] %v341_v37 }
  0xe9   :  { %v155_v38 = vpop.f32.mrf.mxu0  ;;  %v195_v39 = vpop.f32.mrf.mxu1 }
  0xea   :  { %242 = vst [vmem:[%s542_s2 + $0x10] sm:$0xff] %v155_v38  ;;  %250 = vst [vmem:[%s542_s2 + $0x50] sm:$0xff] %v195_v39 }
  0xeb   :  { %v332_v40 = vpop.f32.mrf.mxu0  ;;  %v344_v41 = vpop.f32.mrf.mxu1 }
  0xec   :  { %245 = vst [vmem:[%s542_s2 + $0x28] sm:$0xff] %v332_v40  ;;  %253 = vst [vmem:[%s542_s2 + $0x68] sm:$0xff] %v344_v41 }
  0xed   :  { %v165_v42 = vpop.f32.mrf.mxu0  ;;  %v205_v43 = vpop.f32.mrf.mxu1 }
  0xee   :  { %244 = vst [vmem:[%s542_s2 + $0x20] sm:$0xff] %v165_v42  ;;  %252 = vst [vmem:[%s542_s2 + $0x60] sm:$0xff] %v205_v43 }
  0xef   :  { %v335_v44 = vpop.f32.mrf.mxu0  ;;  %v347_v45 = vpop.f32.mrf.mxu1 }
  0xf0   :  { %247 = vst [vmem:[%s542_s2 + $0x38] sm:$0xff] %v335_v44  ;;  %255 = vst [vmem:[%s542_s2 + $0x78] sm:$0xff] %v347_v45 }
  0xf1   :  { %v175_v46 = vpop.f32.mrf.mxu0  ;;  %v215_v47 = vpop.f32.mrf.mxu1 }
  0xf2   :  { %246 = vst [vmem:[%s542_s2 + $0x30] sm:$0xff] %v175_v46  ;;  %254 = vst [vmem:[%s542_s2 + $0x70] sm:$0xff] %v215_v47 }

// kernel: hgnn_conv.2
= control target key start
LH: loop header
LB: loop body
LE: loop exit
PB: predicated region body
PF: predicated region fallthrough
CT: control target
= control target key end

     0   :  { %s625_s1 = inlined_call_operand.vmem [shape: f32[128,128], index: 1, kind: input, shape index: {}]   ;;  %s626_s0 = inlined_call_operand.vmem [shape: f32[128,128], index: 0, kind: input, shape index: {}]   ;;  %s627_s2 = inlined_call_operand.vmem [shape: f32[1,128], index: 2, kind: input, shape index: {}]   ;;  %s628_s3 = inlined_call_operand.vmem [shape: f32[128,128], index: 3, kind: output, shape index: {}]  }
   0x1   :  { %v34_v0 = vld [vmem:[%s625_s1] sm:$0xff]  ;;  %v35_v1 = vld [vmem:[%s625_s1 + $0x8] sm:$0xff]  ;;  %v65_v2 = vld [vmem:[%s626_s0 + $0x78] sm:$0xff] }
   0x2   :  { %105 = vxpose.xlu0.b32.start [1/16] %v34_v0, 128  ;;  %v472_v3 = vld [vmem:[%s627_s2] ss:$0 sm:$0xff]  ;;  %v36_v4 = vld [vmem:[%s625_s1 + $0x10] sm:$0xff]  ;;  %v63_v7 = vld [vmem:[%s626_s0 + $0x68] sm:$0xff] }
   0x3   :  { %v88_v5 = vadd.f32 %v472_v3, %v65_v2  ;;  %v64_v6 = vld [vmem:[%s626_s0 + $0x70] sm:$0xff]  ;;  %v62_v9 = vld [vmem:[%s626_s0 + $0x60] sm:$0xff]  ;;  %v86_v10 = vadd.f32 %v472_v3, %v63_v7  ;;  %v61_v11 = vld [vmem:[%s626_s0 + $0x58] sm:$0xff] }
   0x4   :  { %v87_v8 = vadd.f32 %v472_v3, %v64_v6  ;;  %v37_v12 = vld [vmem:[%s625_s1 + $0x18] sm:$0xff]  ;;  %v85_v13 = vadd.f32 %v472_v3, %v62_v9  ;;  %v60_v14 = vld [vmem:[%s626_s0 + $0x50] sm:$0xff]  ;;  %v84_v15 = vadd.f32 %v472_v3, %v61_v11  ;;  %v59_v16 = vld [vmem:[%s626_s0 + $0x48] sm:$0xff] }
   0x5   :  { %351 = vmatprep.subr.mxu0 %v88_v5  ;;  %407 = vmatprep.subr.mxu1 %v88_v5  ;;  %v38_v17 = vld [vmem:[%s625_s1 + $0x20] sm:$0xff]  ;;  %v83_v18 = vadd.f32 %v472_v3, %v60_v14  ;;  %v82_v20 = vadd.f32 %v472_v3, %v59_v16  ;;  %v57_v21 = vld [vmem:[%s626_s0 + $0x38] sm:$0xff]  ;;  %v39_v22 = vld [vmem:[%s625_s1 + $0x28] sm:$0xff] }
   0x6   :  { %106 = vxpose.xlu0.b32.cont [2/16] %v35_v1, 128  ;;  %352 = vmatpush3.msra.mxu0 %v88_v5  ;;  %v58_v19 = vld [vmem:[%s626_s0 + $0x40] sm:$0xff]  ;;  %v56_v24 = vld [vmem:[%s626_s0 + $0x30] sm:$0xff]  ;;  %v80_v25 = vadd.f32 %v472_v3, %v57_v21  ;;  %v55_v26 = vld [vmem:[%s626_s0 + $0x28] sm:$0xff] }
   0x7   :  { %353 = vmatprep.subr.mxu0 %v87_v8  ;;  %423 = vmatpush3.msra.mxu1 %v88_v5  ;;  %v81_v23 = vadd.f32 %v472_v3, %v58_v19  ;;  %v40_v27 = vld [vmem:[%s625_s1 + $0x30] sm:$0xff]  ;;  %v79_v28 = vadd.f32 %v472_v3, %v56_v24  ;;  %v54_v29 = vld [vmem:[%s626_s0 + $0x20] sm:$0xff]  ;;  %v78_v30 = vadd.f32 %v472_v3, %v55_v26  ;;  %v53_v31 = vld [vmem:[%s626_s0 + $0x18] sm:$0xff] }
   0x8   :  { %354 = vmatpush3.msra.mxu0 %v87_v8  ;;  %408 = vmatprep.subr.mxu1 %v87_v8  ;;  %v41_v32 = vld [vmem:[%s625_s1 + $0x38] sm:$0xff]  ;;  %v77_v33 = vadd.f32 %v472_v3, %v54_v29  ;;  %v52_v34 = vld [vmem:[%s626_s0 + $0x10] sm:$0xff]  ;;  %v76_v35 = vadd.f32 %v472_v3, %v53_v31  ;;  %v51_v36 = vld [vmem:[%s626_s0 + $0x8] sm:$0xff] }
   0x9   :  { %355 = vmatprep.subr.mxu0 %v86_v10  ;;  %424 = vmatpush3.msra.mxu1 %v87_v8  ;;  %v42_v37 = vld [vmem:[%s625_s1 + $0x40] sm:$0xff]  ;;  %v75_v38 = vadd.f32 %v472_v3, %v52_v34  ;;  %v74_v40 = vadd.f32 %v472_v3, %v51_v36  ;;  %v43_v41 = vld [vmem:[%s625_s1 + $0x48] sm:$0xff]  ;;  %v44_v43 = vld [vmem:[%s625_s1 + $0x50] sm:$0xff] }
   0xa   :  { %107 = vxpose.xlu0.b32.cont [3/16] %v36_v4, 128  ;;  %356 = vmatpush3.msra.mxu0 %v86_v10  ;;  %v50_v39 = vld [vmem:[%s626_s0] sm:$0xff]  ;;  %v45_v44 = vld [vmem:[%s625_s1 + $0x58] sm:$0xff]  ;;  %v47_v46 = vld [vmem:[%s625_s1 + $0x68] sm:$0xff] }
   0xb   :  { %357 = vmatprep.subr.mxu0 %v85_v13  ;;  %409 = vmatprep.subr.mxu1 %v86_v10  ;;  %v73_v42 = vadd.f32 %v472_v3, %v50_v39  ;;  %v46_v45 = vld [vmem:[%s625_s1 + $0x60] sm:$0xff]  ;;  %v48_v47 = vld [vmem:[%s625_s1 + $0x70] sm:$0xff]  ;;  %v49_v48 = vld [vmem:[%s625_s1 + $0x78] sm:$0xff] }
   0xc   :  { %358 = vmatpush3.msra.mxu0 %v85_v13  ;;  %425 = vmatpush3.msra.mxu1 %v86_v10 }
   0xd   :  { %359 = vmatprep.subr.mxu0 %v84_v15  ;;  %410 = vmatprep.subr.mxu1 %v85_v13 }
   0xe   :  { %108 = vxpose.xlu0.b32.cont [4/16] %v37_v12, 128  ;;  %360 = vmatpush3.msra.mxu0 %v84_v15 }
   0xf   :  { %361 = vmatprep.subr.mxu0 %v83_v18  ;;  %426 = vmatpush3.msra.mxu1 %v85_v13 }
  0x10   :  { %362 = vmatpush3.msra.mxu0 %v83_v18  ;;  %411 = vmatprep.subr.mxu1 %v84_v15 }
  0x11   :  { %363 = vmatprep.subr.mxu0 %v82_v20  ;;  %427 = vmatpush3.msra.mxu1 %v84_v15 }
  0x12   :  { %109 = vxpose.xlu0.b32.cont [5/16] %v38_v17, 128  ;;  %364 = vmatpush3.msra.mxu0 %v82_v20 }
  0x13   :  { %365 = vmatprep.subr.mxu0 %v81_v23  ;;  %412 = vmatprep.subr.mxu1 %v83_v18 }
  0x14   :  { %366 = vmatpush3.msra.mxu0 %v81_v23  ;;  %428 = vmatpush3.msra.mxu1 %v83_v18 }
  0x15   :  { %367 = vmatprep.subr.mxu0 %v80_v25  ;;  %413 = vmatprep.subr.mxu1 %v82_v20 }
  0x16   :  { %110 = vxpose.xlu0.b32.cont [6/16] %v39_v22, 128  ;;  %368 = vmatpush3.msra.mxu0 %v80_v25 }
  0x17   :  { %369 = vmatprep.subr.mxu0 %v79_v28  ;;  %429 = vmatpush3.msra.mxu1 %v82_v20 }
  0x18   :  { %370 = vmatpush3.msra.mxu0 %v79_v28  ;;  %414 = vmatprep.subr.mxu1 %v81_v23 }
  0x19   :  { %371 = vmatprep.subr.mxu0 %v78_v30  ;;  %430 = vmatpush3.msra.mxu1 %v81_v23 }
  0x1a   :  { %111 = vxpose.xlu0.b32.cont [7/16] %v40_v27, 128  ;;  %372 = vmatpush3.msra.mxu0 %v78_v30 }
  0x1b   :  { %373 = vmatprep.subr.mxu0 %v77_v33  ;;  %415 = vmatprep.subr.mxu1 %v80_v25 }
  0x1c   :  { %374 = vmatpush3.msra.mxu0 %v77_v33  ;;  %431 = vmatpush3.msra.mxu1 %v80_v25 }
  0x1d   :  { %375 = vmatprep.subr.mxu0 %v76_v35  ;;  %416 = vmatprep.subr.mxu1 %v79_v28 }
  0x1e   :  { %112 = vxpose.xlu0.b32.cont [8/16] %v41_v32, 128  ;;  %376 = vmatpush3.msra.mxu0 %v76_v35 }
  0x1f   :  { %377 = vmatprep.subr.mxu0 %v75_v38  ;;  %432 = vmatpush3.msra.mxu1 %v79_v28 }
  0x20   :  { %378 = vmatpush3.msra.mxu0 %v75_v38  ;;  %417 = vmatprep.subr.mxu1 %v78_v30 }
  0x21   :  { %379 = vmatprep.subr.mxu0 %v74_v40  ;;  %433 = vmatpush3.msra.mxu1 %v78_v30 }
  0x22   :  { %113 = vxpose.xlu0.b32.cont [9/16] %v42_v37, 128  ;;  %380 = vmatpush3.msra.mxu0 %v74_v40 }
  0x23   :  { %381 = vmatprep.subr.mxu0 %v73_v42  ;;  %418 = vmatprep.subr.mxu1 %v77_v33 }
  0x24   :  { %382 = vmatpush3.msra.mxu0 %v73_v42  ;;  %434 = vmatpush3.msra.mxu1 %v77_v33 }
  0x25   :  { %419 = vmatprep.subr.mxu1 %v76_v35 }
  0x26   :  { %114 = vxpose.xlu0.b32.cont [10/16] %v43_v41, 128  ;;  %435 = vmatpush3.msra.mxu1 %v76_v35 }
  0x27   :  { %420 = vmatprep.subr.mxu1 %v75_v38 }
  0x28   :  { %436 = vmatpush3.msra.mxu1 %v75_v38 }
  0x29   :  { %421 = vmatprep.subr.mxu1 %v74_v40 }
  0x2a   :  { %115 = vxpose.xlu0.b32.cont [11/16] %v44_v43, 128  ;;  %437 = vmatpush3.msra.mxu1 %v74_v40 }
  0x2b   :  { %422 = vmatprep.subr.mxu1 %v73_v42 }
  0x2c   :  { %438 = vmatpush3.msra.mxu1 %v73_v42 }
  0x2e   :  { %116 = vxpose.xlu0.b32.cont [12/16] %v45_v44, 128 }
  0x32   :  { %117 = vxpose.xlu0.b32.cont [13/16] %v46_v45, 128 }
  0x36   :  { %118 = vxpose.xlu0.b32.cont [14/16] %v47_v46, 128 }
  0x3a   :  { %119 = vxpose.xlu0.b32.cont [15/16] %v48_v47, 128 }
  0x3e   :  { %120 = vxpose.xlu0.b32.end [16/16] %v49_v48, 128 }
  0x7e   :  { %v121_v49 = vpop.trf.xlu0 }
  0x7f   :  { %383 = vmatprep.mubr.f32.mxu0 %v121_v49 }
  0x82   :  { %v122_v50 = vpop.trf.xlu0 }
  0x83   :  { %384 = vmatmul.mubr.f32.vlgmr.msra.gmra.mxu0 %v122_v50 }
  0x86   :  { %v123_v51 = vpop.trf.xlu0 }
  0x87   :  { %386 = vmatprep.mubr.f32.mxu0 %v123_v51 }
  0x8a   :  { %v124_v52 = vpop.trf.xlu0 }
  0x8b   :  { %387 = vmatmul.mubr.f32.gmra.mxu0 %v124_v52 }
  0x8e   :  { %v125_v53 = vpop.trf.xlu0 }
  0x8f   :  { %389 = vmatprep.mubr.f32.mxu0 %v125_v53 }
  0x92   :  { %v126_v54 = vpop.trf.xlu0 }
  0x93   :  { %390 = vmatmul.mubr.f32.gmra.mxu0 %v126_v54 }
  0x96   :  { %v127_v55 = vpop.trf.xlu0 }
  0x97   :  { %392 = vmatprep.mubr.f32.mxu0 %v127_v55 }
  0x9a   :  { %v128_v56 = vpop.trf.xlu0 }
  0x9b   :  { %393 = vmatmul.mubr.f32.gmra.mxu0 %v128_v56 }
  0x9e   :  { %v129_v57 = vpop.trf.xlu0 }
  0x9f   :  { %395 = vmatprep.mubr.f32.mxu1 %v129_v57 }
  0xa2   :  { %v130_v58 = vpop.trf.xlu0 }
  0xa3   :  { %396 = vmatmul.mubr.f32.vlgmr.msra.gmra.mxu1 %v130_v58 }
  0xa6   :  { %v131_v59 = vpop.trf.xlu0 }
  0xa7   :  { %398 = vmatprep.mubr.f32.mxu1 %v131_v59 }
  0xaa   :  { %v132_v60 = vpop.trf.xlu0 }
  0xab   :  { %399 = vmatmul.mubr.f32.gmra.mxu1 %v132_v60 }
  0xae   :  { %v133_v61 = vpop.trf.xlu0 }
  0xaf   :  { %401 = vmatprep.mubr.f32.mxu1 %v133_v61 }
  0xb2   :  { %v134_v62 = vpop.trf.xlu0 }
  0xb3   :  { %402 = vmatmul.mubr.f32.gmra.mxu1 %v134_v62 }
  0xb6   :  { %v135_v63 = vpop.trf.xlu0 }
  0xb7   :  { %404 = vmatprep.mubr.f32.mxu1 %v135_v63 }
  0xba   :  { %v136_v0 = vpop.trf.xlu0 }
  0xbb   :  { %405 = vmatmul.mubr.f32.gmra.mxu1 %v136_v0 }
 0x143   :  { %v385_v1 = vpop.f32.mrf.mxu0 }
 0x144   :  { %299 = vst [vmem:[%s628_s3 + $0x8] sm:$0xff] %v385_v1 }
 0x145   :  { %v203_v2 = vpop.f32.mrf.mxu0 }
 0x146   :  { %298 = vst [vmem:[%s628_s3] sm:$0xff] %v203_v2 }
 0x14b   :  { %v388_v3 = vpop.f32.mrf.mxu0 }
 0x14c   :  { %301 = vst [vmem:[%s628_s3 + $0x18] sm:$0xff] %v388_v3 }
 0x14d   :  { %v213_v4 = vpop.f32.mrf.mxu0 }
 0x14e   :  { %300 = vst [vmem:[%s628_s3 + $0x10] sm:$0xff] %v213_v4 }
 0x153   :  { %v391_v5 = vpop.f32.mrf.mxu0 }
 0x154   :  { %303 = vst [vmem:[%s628_s3 + $0x28] sm:$0xff] %v391_v5 }
 0x155   :  { %v223_v6 = vpop.f32.mrf.mxu0 }
 0x156   :  { %302 = vst [vmem:[%s628_s3 + $0x20] sm:$0xff] %v223_v6 }
 0x15b   :  { %v394_v7 = vpop.f32.mrf.mxu0 }
 0x15c   :  { %305 = vst [vmem:[%s628_s3 + $0x38] sm:$0xff] %v394_v7 }
 0x15d   :  { %v233_v8 = vpop.f32.mrf.mxu0 }
 0x15e   :  { %304 = vst [vmem:[%s628_s3 + $0x30] sm:$0xff] %v233_v8 }
 0x163   :  { %v397_v9 = vpop.f32.mrf.mxu1 }
 0x164   :  { %307 = vst [vmem:[%s628_s3 + $0x48] sm:$0xff] %v397_v9 }
 0x165   :  { %v243_v10 = vpop.f32.mrf.mxu1 }
 0x166   :  { %306 = vst [vmem:[%s628_s3 + $0x40] sm:$0xff] %v243_v10 }
 0x16b   :  { %v400_v11 = vpop.f32.mrf.mxu1 }
 0x16c   :  { %309 = vst [vmem:[%s628_s3 + $0x58] sm:$0xff] %v400_v11 }
 0x16d   :  { %v253_v12 = vpop.f32.mrf.mxu1 }
 0x16e   :  { %308 = vst [vmem:[%s628_s3 + $0x50] sm:$0xff] %v253_v12 }
 0x173   :  { %v403_v13 = vpop.f32.mrf.mxu1 }
 0x174   :  { %311 = vst [vmem:[%s628_s3 + $0x68] sm:$0xff] %v403_v13 }
 0x175   :  { %v263_v14 = vpop.f32.mrf.mxu1 }
 0x176   :  { %310 = vst [vmem:[%s628_s3 + $0x60] sm:$0xff] %v263_v14 }
 0x17b   :  { %v406_v15 = vpop.f32.mrf.mxu1 }
 0x17c   :  { %313 = vst [vmem:[%s628_s3 + $0x78] sm:$0xff] %v406_v15 }
 0x17d   :  { %v273_v16 = vpop.f32.mrf.mxu1 }
 0x17e   :  { %312 = vst [vmem:[%s628_s3 + $0x70] sm:$0xff] %v273_v16 }

</bundles_post_ra>
